<compile_context>
chip_gen: v7x
topology: tpu7x:2x2x1
jax: 0.10.0
libtpu: 0.0.40
codegen_flags: <defaults>
</compile_context>

<pallas_src>
import functools

import jax
import jax.numpy as jnp
from jax.experimental import pallas as pl
from jax.experimental.pallas import tpu as pltpu


def _round_up(n, m):
    return ((n + m - 1) // m) * m


def _mlp_kernel(x_ref, w1_ref, b1_ref, w2_ref, b2_ref, w3_ref, b3_ref,
                w4_ref, b4_ref, o_ref):
    """One batch tile of the 4-layer MLP.

    x_ref:  [TB, F]    f32   (F = input_dim, un-padded)
    wN_ref: [in, out]  bf16  (w4 cols zero-padded to 128)
    bN_ref: [1, out]   f32   (b4 zero-padded to 128)
    o_ref:  [TB, 128]  f32   (cols 64..127 are padding, sliced off outside)
    """
    # Layer 1: [TB, F] @ [F, 512] -> f32 acc; fuse bias + ReLU + bf16 downcast.
    h = jnp.dot(x_ref[...].astype(jnp.bfloat16), w1_ref[...],
                preferred_element_type=jnp.float32)
    h = jnp.maximum(h + b1_ref[...], 0.0).astype(jnp.bfloat16)

    # Layer 2: [TB, 512] @ [512, 256]
    h = jnp.dot(h, w2_ref[...], preferred_element_type=jnp.float32)
    h = jnp.maximum(h + b2_ref[...], 0.0).astype(jnp.bfloat16)

    # Layer 3: [TB, 256] @ [256, 128]
    h = jnp.dot(h, w3_ref[...], preferred_element_type=jnp.float32)
    h = jnp.maximum(h + b3_ref[...], 0.0).astype(jnp.bfloat16)

    # Layer 4 (no activation): [TB, 128] @ [128, 128] (cols 64..127 are zero pad).
    h = jnp.dot(h, w4_ref[...], preferred_element_type=jnp.float32) + b4_ref[...]

    o_ref[...] = h.astype(o_ref.dtype)   # lane-dense [TB, 128] unmasked store


@functools.partial(jax.jit, static_argnames=("block_b",))
def simple_linear_bottom(x, params, *, block_b=1024):
    """Pallas-backed forward of SimpleLinearBottom.

    x:      [B, input_dim] float32
    params: dict from init_params (bf16 weights stored [in, out]; f32 biases;
            layer-4 N zero-padded to 128)
    returns [B, 64] float32
    """
    B, F = x.shape
    out_pad = params["w4"].shape[1]     # 128
    out_dim = 64

    # Batch tile: aim for >=2 grid steps (v7x megacore) while staying <= block_b.
    # No wrapper-side batch padding -- Pallas masks the ragged last block's stores.
    if B <= 8:
        tb = B                          # block == full batch dim (legal, grid of 1)
    else:
        tb = min(block_b, _round_up(pl.cdiv(B, 2), 8))
    grid = (pl.cdiv(B, tb),)

    x_spec = pl.BlockSpec((tb, F), lambda i: (i, 0))
    out_spec = pl.BlockSpec((tb, out_pad), lambda i: (i, 0))
    # Constant block index -> Pallas keeps these VMEM-resident across grid steps.
    resident = lambda shape: pl.BlockSpec(shape, lambda i: (0, 0))

    operands = (
        x,
        params["w1"], params["b1"],
        params["w2"], params["b2"],
        params["w3"], params["b3"],
        params["w4"], params["b4"],
    )
    in_specs = [x_spec] + [resident(op.shape) for op in operands[1:]]

    out = pl.pallas_call(
        _mlp_kernel,
        out_shape=jax.ShapeDtypeStruct((B, out_pad), jnp.float32),
        grid=grid,
        in_specs=in_specs,
        out_specs=out_spec,
        compiler_params=pltpu.CompilerParams(
            dimension_semantics=("parallel",),
            vmem_limit_bytes=32 << 20,
        ),
    )(*operands)

    return out[:, :out_dim]


def init_params(key, input_dim):
    """Mirror the PyTorch init (xavier_uniform_ weights, biases = 0.01).

    Weights are stored transposed ([in, out]) in bf16 (accepted precision trade-off
    vs PyTorch f32). Only layer 4's output dim is zero-padded to 128 so the final
    store is lane-dense; w1 keeps its true K = input_dim.
    """
    dims = [(input_dim, 512), (512, 256), (256, 128), (128, 64)]
    out_pad = 128

    params = {}
    keys = jax.random.split(key, len(dims))
    for i, ((fan_in, fan_out), k) in enumerate(zip(dims, keys), start=1):
        bound = (6.0 / (fan_in + fan_out)) ** 0.5
        w = jax.random.uniform(k, (fan_in, fan_out), jnp.float32,
                               minval=-bound, maxval=bound)
        b = jnp.full((1, fan_out), 0.01, dtype=jnp.float32)
        if i == 4 and fan_out < out_pad:        # pad N with zero cols (lane-dense)
            w = jnp.pad(w, ((0, 0), (0, out_pad - fan_out)))
            b = jnp.pad(b, ((0, 0), (0, out_pad - fan_out)))
        params[f"w{i}"] = w.astype(jnp.bfloat16)
        params[f"b{i}"] = b
    return params


def _reference_forward(x, params):
    """Plain-JAX reference with identical precision (bf16 operands, f32 accumulate)."""
    h = x.astype(jnp.bfloat16)
    for i in range(1, 5):
        h = jnp.dot(h, params[f"w{i}"],
                    preferred_element_type=jnp.float32) + params[f"b{i}"]
        if i < 4:
            h = jnp.maximum(h, 0.0).astype(jnp.bfloat16)
    return h[:, :64]


if __name__ == "__main__":
    key = jax.random.PRNGKey(0)
    k_param, k_x = jax.random.split(key)

    input_dim = 32   # small synthetic feature count
    batch = 8

    params = init_params(k_param, input_dim)
    x = jax.random.normal(k_x, (batch, input_dim), dtype=jnp.float32)

    out = simple_linear_bottom(x, params)
    out = jax.block_until_ready(out)

    ref = _reference_forward(x, params)
    assert out.shape == (batch, 64), out.shape
    assert jnp.allclose(out, ref, atol=1e-2, rtol=1e-2), "mismatch vs reference"

    print("KERNEL_OK")
</pallas_src>

<mosaic_0001>
module attributes {stable_mosaic.version = 11 : i64} {
  func.func @_mlp_kernel(%arg0: i32, %arg1: memref<8x32xf32, #tpu.memory_space<vmem>>, %arg2: memref<32x512xbf16, #tpu.memory_space<vmem>>, %arg3: memref<1x512xf32, #tpu.memory_space<vmem>>, %arg4: memref<512x256xbf16, #tpu.memory_space<vmem>>, %arg5: memref<1x256xf32, #tpu.memory_space<vmem>>, %arg6: memref<256x128xbf16, #tpu.memory_space<vmem>>, %arg7: memref<1x128xf32, #tpu.memory_space<vmem>>, %arg8: memref<128x128xbf16, #tpu.memory_space<vmem>>, %arg9: memref<1x128xf32, #tpu.memory_space<vmem>>, %arg10: memref<8x128xf32, #tpu.memory_space<vmem>>) attributes {dimension_semantics = [#tpu.dimension_semantics<parallel>], iteration_bounds = array<i64: 1>, scalar_prefetch = 0 : i64, scratch_operands = 0 : i64, tpu.core_type = #tpu.core_type<tc>, window_params = [{transform_indices = @transform_0, window_bounds = array<i64: 8, 32>}, {pipeline_mode = #tpu.pipeline_mode<synchronous>, transform_indices = @transform_1, window_bounds = array<i64: 32, 512>}, {pipeline_mode = #tpu.pipeline_mode<synchronous>, transform_indices = @transform_2, window_bounds = array<i64: 1, 512>}, {pipeline_mode = #tpu.pipeline_mode<synchronous>, transform_indices = @transform_3, window_bounds = array<i64: 512, 256>}, {pipeline_mode = #tpu.pipeline_mode<synchronous>, transform_indices = @transform_4, window_bounds = array<i64: 1, 256>}, {pipeline_mode = #tpu.pipeline_mode<synchronous>, transform_indices = @transform_5, window_bounds = array<i64: 256, 128>}, {pipeline_mode = #tpu.pipeline_mode<synchronous>, transform_indices = @transform_6, window_bounds = array<i64: 1, 128>}, {pipeline_mode = #tpu.pipeline_mode<synchronous>, transform_indices = @transform_7, window_bounds = array<i64: 128, 128>}, {pipeline_mode = #tpu.pipeline_mode<synchronous>, transform_indices = @transform_8, window_bounds = array<i64: 1, 128>}, {transform_indices = @transform_9, window_bounds = array<i64: 8, 128>}]} {
    %c0 = arith.constant 0 : index
    %c0_0 = arith.constant 0 : index
    %0 = vector.load %arg1[%c0, %c0_0] : memref<8x32xf32, #tpu.memory_space<vmem>>, vector<8x32xf32>
    %1 = arith.truncf %0 : vector<8x32xf32> to vector<8x32xbf16>
    %c0_1 = arith.constant 0 : index
    %c0_2 = arith.constant 0 : index
    %2 = vector.load %arg2[%c0_1, %c0_2] : memref<32x512xbf16, #tpu.memory_space<vmem>>, vector<32x512xbf16>
    %cst = arith.constant dense<0.000000e+00> : vector<8x512xf32>
    %3 = tpu.matmul %1, %2, %cst {dimension_numbers = #tpu.dot_dimension_numbers<[1], [0], [0], [1], [0, 0, 1, 1], [], []>} : vector<8x32xbf16>, vector<32x512xbf16>, vector<8x512xf32> -> vector<8x512xf32>
    %c0_3 = arith.constant 0 : index
    %c0_4 = arith.constant 0 : index
    %4 = vector.load %arg3[%c0_3, %c0_4] : memref<1x512xf32, #tpu.memory_space<vmem>>, vector<1x512xf32>
    %5 = vector.broadcast %4 : vector<1x512xf32> to vector<8x512xf32>
    %6 = arith.addf %3, %5 : vector<8x512xf32>
    %cst_5 = arith.constant 0.000000e+00 : f32
    %7 = vector.broadcast %cst_5 : f32 to vector<8x512xf32>
    %8 = arith.maximumf %6, %7 : vector<8x512xf32>
    %9 = arith.truncf %8 : vector<8x512xf32> to vector<8x512xbf16>
    %c0_6 = arith.constant 0 : index
    %c0_7 = arith.constant 0 : index
    %10 = vector.load %arg4[%c0_6, %c0_7] : memref<512x256xbf16, #tpu.memory_space<vmem>>, vector<512x256xbf16>
    %cst_8 = arith.constant dense<0.000000e+00> : vector<8x256xf32>
    %11 = tpu.matmul %9, %10, %cst_8 {dimension_numbers = #tpu.dot_dimension_numbers<[1], [0], [0], [1], [0, 0, 1, 1], [], []>} : vector<8x512xbf16>, vector<512x256xbf16>, vector<8x256xf32> -> vector<8x256xf32>
    %c0_9 = arith.constant 0 : index
    %c0_10 = arith.constant 0 : index
    %12 = vector.load %arg5[%c0_9, %c0_10] : memref<1x256xf32, #tpu.memory_space<vmem>>, vector<1x256xf32>
    %13 = vector.broadcast %12 : vector<1x256xf32> to vector<8x256xf32>
    %14 = arith.addf %11, %13 : vector<8x256xf32>
    %cst_11 = arith.constant 0.000000e+00 : f32
    %15 = vector.broadcast %cst_11 : f32 to vector<8x256xf32>
    %16 = arith.maximumf %14, %15 : vector<8x256xf32>
    %17 = arith.truncf %16 : vector<8x256xf32> to vector<8x256xbf16>
    %c0_12 = arith.constant 0 : index
    %c0_13 = arith.constant 0 : index
    %18 = vector.load %arg6[%c0_12, %c0_13] : memref<256x128xbf16, #tpu.memory_space<vmem>>, vector<256x128xbf16>
    %cst_14 = arith.constant dense<0.000000e+00> : vector<8x128xf32>
    %19 = tpu.matmul %17, %18, %cst_14 {dimension_numbers = #tpu.dot_dimension_numbers<[1], [0], [0], [1], [0, 0, 1, 1], [], []>} : vector<8x256xbf16>, vector<256x128xbf16>, vector<8x128xf32> -> vector<8x128xf32>
    %c0_15 = arith.constant 0 : index
    %c0_16 = arith.constant 0 : index
    %20 = vector.load %arg7[%c0_15, %c0_16] : memref<1x128xf32, #tpu.memory_space<vmem>>, vector<1x128xf32>
    %21 = vector.broadcast %20 : vector<1x128xf32> to vector<8x128xf32>
    %22 = arith.addf %19, %21 : vector<8x128xf32>
    %cst_17 = arith.constant 0.000000e+00 : f32
    %23 = vector.broadcast %cst_17 : f32 to vector<8x128xf32>
    %24 = arith.maximumf %22, %23 : vector<8x128xf32>
    %25 = arith.truncf %24 : vector<8x128xf32> to vector<8x128xbf16>
    %c0_18 = arith.constant 0 : index
    %c0_19 = arith.constant 0 : index
    %26 = vector.load %arg8[%c0_18, %c0_19] : memref<128x128xbf16, #tpu.memory_space<vmem>>, vector<128x128xbf16>
    %cst_20 = arith.constant dense<0.000000e+00> : vector<8x128xf32>
    %27 = tpu.matmul %25, %26, %cst_20 {dimension_numbers = #tpu.dot_dimension_numbers<[1], [0], [0], [1], [0, 0, 1, 1], [], []>} : vector<8x128xbf16>, vector<128x128xbf16>, vector<8x128xf32> -> vector<8x128xf32>
    %c0_21 = arith.constant 0 : index
    %c0_22 = arith.constant 0 : index
    %28 = vector.load %arg9[%c0_21, %c0_22] : memref<1x128xf32, #tpu.memory_space<vmem>>, vector<1x128xf32>
    %29 = vector.broadcast %28 : vector<1x128xf32> to vector<8x128xf32>
    %30 = arith.addf %27, %29 : vector<8x128xf32>
    %c0_23 = arith.constant 0 : index
    %c0_24 = arith.constant 0 : index
    %31 = vector.load %arg10[%c0_23, %c0_24] : memref<8x128xf32, #tpu.memory_space<vmem>>, vector<8x128xf32>
    tpu.vector_store %arg10[%c0_23, %c0_24], %30 {strides = array<i32>} : memref<8x128xf32, #tpu.memory_space<vmem>>, vector<8x128xf32>,
    return
  }
  func.func @transform_0(%arg0: i32) -> (i32, i32) {
    %c0_i32 = arith.constant 0 : i32
    %c0_i32_0 = arith.constant 0 : i32
    return %arg0, %c0_i32 : i32, i32
  }
  func.func @transform_1(%arg0: i32) -> (i32, i32) {
    %c0_i32 = arith.constant 0 : i32
    %c0_i32_0 = arith.constant 0 : i32
    %c0_i32_1 = arith.constant 0 : i32
    return %c0_i32, %c0_i32_0 : i32, i32
  }
  func.func @transform_2(%arg0: i32) -> (i32, i32) {
    %c0_i32 = arith.constant 0 : i32
    %c0_i32_0 = arith.constant 0 : i32
    %c0_i32_1 = arith.constant 0 : i32
    return %c0_i32, %c0_i32_0 : i32, i32
  }
  func.func @transform_3(%arg0: i32) -> (i32, i32) {
    %c0_i32 = arith.constant 0 : i32
    %c0_i32_0 = arith.constant 0 : i32
    %c0_i32_1 = arith.constant 0 : i32
    return %c0_i32, %c0_i32_0 : i32, i32
  }
  func.func @transform_4(%arg0: i32) -> (i32, i32) {
    %c0_i32 = arith.constant 0 : i32
    %c0_i32_0 = arith.constant 0 : i32
    %c0_i32_1 = arith.constant 0 : i32
    return %c0_i32, %c0_i32_0 : i32, i32
  }
  func.func @transform_5(%arg0: i32) -> (i32, i32) {
    %c0_i32 = arith.constant 0 : i32
    %c0_i32_0 = arith.constant 0 : i32
    %c0_i32_1 = arith.constant 0 : i32
    return %c0_i32, %c0_i32_0 : i32, i32
  }
  func.func @transform_6(%arg0: i32) -> (i32, i32) {
    %c0_i32 = arith.constant 0 : i32
    %c0_i32_0 = arith.constant 0 : i32
    %c0_i32_1 = arith.constant 0 : i32
    return %c0_i32, %c0_i32_0 : i32, i32
  }
  func.func @transform_7(%arg0: i32) -> (i32, i32) {
    %c0_i32 = arith.constant 0 : i32
    %c0_i32_0 = arith.constant 0 : i32
    %c0_i32_1 = arith.constant 0 : i32
    return %c0_i32, %c0_i32_0 : i32, i32
  }
  func.func @transform_8(%arg0: i32) -> (i32, i32) {
    %c0_i32 = arith.constant 0 : i32
    %c0_i32_0 = arith.constant 0 : i32
    %c0_i32_1 = arith.constant 0 : i32
    return %c0_i32, %c0_i32_0 : i32, i32
  }
  func.func @transform_9(%arg0: i32) -> (i32, i32) {
    %c0_i32 = arith.constant 0 : i32
    %c0_i32_0 = arith.constant 0 : i32
    return %arg0, %c0_i32 : i32, i32
  }
}

</mosaic_0001>

<bundles_post_ra>
// kernel: simple_linear_bottom.1
= control target key start
LH: loop header
LB: loop body
LE: loop exit
PB: predicated region body
PF: predicated region fallthrough
CT: control target
= control target key end

     0   :  { %14 = vsyncpa [#allocation3], 0  ;;  %s1720_s0 = inlined_call_operand.hbm [shape: f32[8,32], index: 0, kind: input, shape index: {}]   ;;  %s1721_s1 = inlined_call_operand.hbm [shape: bf16[32,512], index: 1, kind: input, shape index: {}]   ;;  %s1722_s2 = inlined_call_operand.hbm [shape: f32[1,512], index: 2, kind: input, shape index: {}]   ;;  %s1723_s3 = inlined_call_operand.hbm [shape: bf16[512,256], index: 3, kind: input, shape index: {}]   ;;  %s1724_s4 = inlined_call_operand.vmem [shape: f32[1,256], index: 4, kind: input, shape index: {}]   ;;  %s1725_s5 = inlined_call_operand.hbm [shape: bf16[256,128], index: 5, kind: input, shape index: {}]   ;;  %s1726_s6 = inlined_call_operand.vmem [shape: f32[1,128], index: 6, kind: input, shape index: {}]   ;;  %s1727_s7 = inlined_call_operand.hbm [shape: bf16[128,128], index: 7, kind: input, shape index: {}]   ;;  %s1728_s8 = inlined_call_operand.vmem [shape: f32[1,128], index: 8, kind: input, shape index: {}]   ;;  %s1729_s9 = inlined_call_operand.hbm [shape: f32[8,128], index: 9, kind: output, shape index: {}]  }
   0x1   :  { %15 = vsyncpa [#allocation6], 0 }
   0x2   :  { %16 = vsyncpa [#allocation9], 0 }
   0x3   :  { %17 = vsyncpa [#allocation12], 0 }
   0x4   :  { %18 = vsyncpa [#allocation4], 0  ;;  %s1536_s30 = smov [#allocation5]   ;;  %s1372_s13 = scalar_lea.hbm %s1721_s1, 1024 }
   0x5   :  { %s34_s10 = sshll.u32 %s1536_s30, 4  ;;  %p1373_p0 = scmp.ne.s32.totalorder %s1721_s1, %s1372_s13  ;;  %s35_s10 = int_to_ptr.vmem [resolvable:$true] %s34_s10 }
   0x6   :  { %p1376_p1 = scmp.lt.u32.totalorder %s1372_s13, %s1721_s1 }
   0x8   :  { %p1378_p2 = pnand %p1376_p1, %p1373_p0 }
   0xa   :  { %1381 = shalt.err (!%p1378_p2)
}
   0xb   :  { %s1382_s18 = scalar_lea.vmem %s35_s10, 1024  ;;  %p1387_p4 = scmp.lt.s32.totalorder %s35_s10, %s35_s10 }
   0xc   :  { %p1383_p3 = scmp.ne.s32.totalorder %s35_s10, %s1382_s18  ;;  %p1388_p5 = scmp.lt.s32.totalorder %s1382_s18, %s1382_s18 }
   0xe   :  { %p1389_p6 = por %p1388_p5, %p1387_p4 }
  0x10   :  { %p1390_p7 = pnand %p1389_p6, %p1383_p3 }
  0x12   :  { %1393 = shalt.err (!%p1390_p7)
}
  0x13   :  { %s1537_s19 = smov 256   ;;  %s1538_s20 = smov 16  }
  0x14   :  { %40 = dma.hbm_to_vmem [thread:$0]  %s1721_s1, 1024, %s35_s10, [#allocation6], %s1537_s19, %s1537_s19, %s1538_s20  }
  0x15   :  { %s1539_s23 = smov [#allocation8]   ;;  %s1394_s27 = scalar_lea.hbm %s1723_s3, 8192 }
  0x16   :  { %s56_s24 = sshll.u32 %s1539_s23, 4  ;;  %p1395_p8 = scmp.ne.s32.totalorder %s1723_s3, %s1394_s27  ;;  %s57_s24 = int_to_ptr.vmem [resolvable:$true] %s56_s24 }
  0x17   :  { %p1398_p9 = scmp.lt.u32.totalorder %s1394_s27, %s1723_s3 }
  0x19   :  { %p1400_p10 = pnand %p1398_p9, %p1395_p8 }
  0x1b   :  { %1403 = shalt.err (!%p1400_p10)
}
  0x1c   :  { %s1404_s12 = scalar_lea.vmem %s57_s24, 8192  ;;  %p1409_p12 = scmp.lt.s32.totalorder %s57_s24, %s57_s24 }
  0x1d   :  { %p1405_p11 = scmp.ne.s32.totalorder %s57_s24, %s1404_s12  ;;  %p1410_p13 = scmp.lt.s32.totalorder %s1404_s12, %s1404_s12 }
  0x1f   :  { %p1411_p0 = por %p1410_p13, %p1409_p12 }
  0x21   :  { %p1412_p1 = pnand %p1411_p0, %p1405_p11 }
  0x23   :  { %1415 = shalt.err (!%p1412_p1)
}
  0x24   :  { %s1540_s1 = smov 128   ;;  %s1541_s10 = smov 8  }
  0x25   :  { %62 = dma.hbm_to_vmem [thread:$0]  %s1723_s3, 8192, %s57_s24, [#allocation9], %s1540_s1, %s1540_s1, %s1541_s10  }
  0x26   :  { %s1542_s15 = smov [#allocation2]   ;;  %s1543_s17 = smov [#allocation7]  }
  0x27   :  { %s25_s16 = sshll.u32 %s1542_s15, 4  ;;  %s47_s18 = sshll.u32 %s1543_s17, 4  ;;  %s26_s16 = int_to_ptr.vmem [resolvable:$true] %s25_s16  ;;  %s48_s18 = int_to_ptr.vmem [resolvable:$true] %s47_s18 }
  0x28   :  { %s1416_s21 = scalar_lea.hbm %s1720_s0, 128 }
  0x29   :  { %p1417_p2 = scmp.ne.s32.totalorder %s1720_s0, %s1416_s21  ;;  %p1420_p3 = scmp.lt.u32.totalorder %s1416_s21, %s1720_s0 }
  0x2b   :  { %p1422_p4 = pnand %p1420_p3, %p1417_p2 }
  0x2d   :  { %1425 = shalt.err (!%p1422_p4)
}
  0x2e   :  { %s1426_s3 = scalar_lea.vmem %s26_s16, 128  ;;  %p1431_p6 = scmp.lt.s32.totalorder %s26_s16, %s26_s16 }
  0x2f   :  { %p1427_p5 = scmp.ne.s32.totalorder %s26_s16, %s1426_s3  ;;  %p1432_p7 = scmp.lt.s32.totalorder %s1426_s3, %s1426_s3 }
  0x31   :  { %p1433_p8 = por %p1432_p7, %p1431_p6 }
  0x33   :  { %p1434_p9 = pnand %p1433_p8, %p1427_p5 }
  0x35   :  { %1437 = shalt.err (!%p1434_p9)
}
  0x36   :  { %28 = dma.hbm_to_vmem [thread:$0]  %s1720_s0, 128, %s26_s16, [#allocation3]  }
  0x37   :  { %s1438_s30 = scalar_lea.hbm %s1722_s2, 64 }
  0x38   :  { %p1439_p10 = scmp.ne.s32.totalorder %s1722_s2, %s1438_s30  ;;  %p1442_p11 = scmp.lt.u32.totalorder %s1438_s30, %s1722_s2 }
  0x3a   :  { %p1444_p12 = pnand %p1442_p11, %p1439_p10 }
  0x3c   :  { %1447 = shalt.err (!%p1444_p12)
}
  0x3d   :  { %s1448_s13 = scalar_lea.vmem %s48_s18, 64  ;;  %p1453_p0 = scmp.lt.s32.totalorder %s48_s18, %s48_s18 }
  0x3e   :  { %p1449_p13 = scmp.ne.s32.totalorder %s48_s18, %s1448_s13  ;;  %p1454_p1 = scmp.lt.s32.totalorder %s1448_s13, %s1448_s13 }
  0x40   :  { %p1455_p2 = por %p1454_p1, %p1453_p0 }
  0x42   :  { %p1456_p3 = pnand %p1455_p2, %p1449_p13 }
  0x44   :  { %1459 = shalt.err (!%p1456_p3)
}
  0x45   :  { %50 = dma.hbm_to_vmem [thread:$0]  %s1722_s2, 64, %s48_s18, [#allocation6]  }
  0x46   :  { %s1544_s15 = smov [#allocation10]   ;;  %s1460_s20 = scalar_lea.hbm %s1725_s5, 2048 }
  0x47   :  { %s70_s16 = sshll.u32 %s1544_s15, 4  ;;  %p1461_p4 = scmp.ne.s32.totalorder %s1725_s5, %s1460_s20  ;;  %s71_s16 = int_to_ptr.vmem [resolvable:$true] %s70_s16 }
  0x48   :  { %p1464_p5 = scmp.lt.u32.totalorder %s1460_s20, %s1725_s5 }
  0x4a   :  { %p1466_p6 = pnand %p1464_p5, %p1461_p4 }
  0x4c   :  { %1469 = shalt.err (!%p1466_p6)
}
  0x4d   :  { %s1470_s26 = scalar_lea.vmem %s71_s16, 2048  ;;  %p1475_p8 = scmp.lt.s32.totalorder %s71_s16, %s71_s16 }
  0x4e   :  { %p1471_p7 = scmp.ne.s32.totalorder %s71_s16, %s1470_s26  ;;  %p1476_p9 = scmp.lt.s32.totalorder %s1470_s26, %s1470_s26 }
  0x50   :  { %p1477_p10 = por %p1476_p9, %p1475_p8 }
  0x52   :  { %p1478_p11 = pnand %p1477_p10, %p1471_p7 }
  0x54   :  { %1481 = shalt.err (!%p1478_p11)
}
  0x55   :  { %s1545_s2 = smov 64   ;;  %s1546_s18 = smov 4  }
  0x56   :  { %76 = dma.hbm_to_vmem [thread:$0]  %s1725_s5, 2048, %s71_s16, [#allocation9], %s1545_s2, %s1545_s2, %s1546_s18  }
  0x57   :  { %s1547_s27 = smov [#allocation11]   ;;  %s1482_s11 = scalar_lea.hbm %s1727_s7, 1024 }
  0x58   :  { %s84_s28 = sshll.u32 %s1547_s27, 4  ;;  %p1483_p12 = scmp.ne.s32.totalorder %s1727_s7, %s1482_s11  ;;  %s85_s28 = int_to_ptr.vmem [resolvable:$true] %s84_s28 }
  0x59   :  { %p1486_p13 = scmp.lt.u32.totalorder %s1482_s11, %s1727_s7 }
  0x5b   :  { %p1488_p0 = pnand %p1486_p13, %p1483_p12 }
  0x5d   :  { %1491 = shalt.err (!%p1488_p0)
}
  0x5e   :  { %s1492_s0 = scalar_lea.vmem %s85_s28, 1024  ;;  %p1497_p2 = scmp.lt.s32.totalorder %s85_s28, %s85_s28 }
  0x5f   :  { %p1493_p1 = scmp.ne.s32.totalorder %s85_s28, %s1492_s0  ;;  %p1498_p3 = scmp.lt.s32.totalorder %s1492_s0, %s1492_s0 }
  0x61   :  { %p1499_p4 = por %p1498_p3, %p1497_p2 }
  0x63   :  { %p1500_p5 = pnand %p1499_p4, %p1493_p1 }
  0x65   :  { %1503 = shalt.err (!%p1500_p5)
}
  0x66   :  { %90 = dma.hbm_to_vmem [thread:$0]  %s1727_s7, 1024, %s85_s28, [#allocation12], %s1545_s2, %s1545_s2, %s1546_s18  }
  0x67   :  { %1526 = dma.done.wait [#allocation3], 128  }
  0x68   :  { %1527 = vsyncadd [#allocation3], 4294967168 }
  0x69   :  { %1528 = dma.done.wait [#allocation6], 1088  }
  0x6a   :  { %1529 = vsyncadd [#allocation6], 4294966208 }
  0x6b   :  { %1530 = dma.done.wait [#allocation9], 10240  }
  0x6c   :  { %1531 = vsyncadd [#allocation9], 4294957056 }
  0x6d   :  { %1532 = dma.done.wait [#allocation12], 1024  }
  0x6e   :  { %1533 = vsyncadd [#allocation12], 4294966272  ;;  %v1548_v0 = vmov 0   ;;  %v1240_v1 = vld [vmem:[#allocation5 + $0x4] ss:$16 sps:$4 sm:$0xff]   ;;  %v112_v5 = vld [vmem:[#allocation2] sm:$0xff]  ;;  %v124_v56 = vlaneseq }
  0x6f   :  { %220 = vmatprep.mubr.bf16.mxu1 %v1548_v0  ;;  %v1242_v2 = vld [vmem:[#allocation5] ss:$16 sps:$4 sm:$0xff]   ;;  %188 = vmatprep.subr.bf16.mxu1 %v1240_v1  ;;  %v1243_v3 = vld [vmem:[#allocation5 + $0x24] ss:$16 sps:$4 sm:$0xff]   ;;  %v1248_v6 = vld [vmem:[#allocation5 + $0xc] ss:$16 sps:$4 sm:$0xff]   ;;  %v113_v8 = vpack.c.bf16 %v112_v5, %v112_v5 }
  0x70   :  { %v1245_v4 = vld [vmem:[#allocation5 + $0x20] ss:$16 sps:$4 sm:$0xff]   ;;  %189 = vmatpush1.bf16.msra.mxu1 %v1242_v2  ;;  %v1246_v7 = vld [vmem:[#allocation5 + $0x8] ss:$16 sps:$4 sm:$0xff]   ;;  %v1254_v10 = vld [vmem:[#allocation8] ss:$8 sps:$4 sm:$0xff]  }
  0x71   :  { %190 = vmatprep.subr.bf16.mxu1 %v1243_v3  ;;  %v1252_v9 = vld [vmem:[#allocation8 + $0x4] ss:$8 sps:$4 sm:$0xff]   ;;  %vm184_vm0 = vcmask 261120   ;;  %v1255_v11 = vld [vmem:[#allocation8 + $0x14] ss:$8 sps:$4 sm:$0xff]   ;;  %v1676_v57 = vshrl.u32 %v124_v56, 7 }
  0x72   :  { %v1251_v12 = vld [vmem:[#allocation5 + $0x2c] ss:$16 sps:$4 sm:$0xff]   ;;  %674 = vmatprep.subr.bf16.mxu0 %v1252_v9  ;;  %v1258_v14 = vld [vmem:[#allocation8 + $0x24] ss:$8 sps:$4 sm:$0xff]   ;;  %v1261_v17 = vld [vmem:[#allocation8 + $0x34] ss:$8 sps:$4 sm:$0xff]  }
  0x73   :  { %675 = vmatpush1.bf16.msra.mxu0 %v1254_v10  ;;  %v1257_v13 = vld [vmem:[#allocation8 + $0x10] ss:$8 sps:$4 sm:$0xff]   ;;  %v1249_v15 = vld [vmem:[#allocation5 + $0x28] ss:$16 sps:$4 sm:$0xff]   ;;  %v1260_v16 = vld [vmem:[#allocation8 + $0x20] ss:$8 sps:$4 sm:$0xff]  }
  0x74   :  { %191 = vmatpush1.bf16.msra.mxu1 %v1245_v4  ;;  %676 = vmatprep.subr.bf16.mxu0 %v1255_v11  ;;  %v1263_v18 = vld [vmem:[#allocation8 + $0x30] ss:$8 sps:$4 sm:$0xff]   ;;  %v1264_v19 = vld [vmem:[#allocation8 + $0x44] ss:$8 sps:$4 sm:$0xff]   ;;  %v1266_v20 = vld [vmem:[#allocation8 + $0x40] ss:$8 sps:$4 sm:$0xff]  }
  0x75   :  { %229 = vmatprep.subr.bf16.mxu1 %v1248_v6  ;;  %v1267_v21 = vld [vmem:[#allocation8 + $0x54] ss:$8 sps:$4 sm:$0xff]   ;;  %v1269_v22 = vld [vmem:[#allocation8 + $0x50] ss:$8 sps:$4 sm:$0xff]   ;;  %v1270_v23 = vld [vmem:[#allocation8 + $0x64] ss:$8 sps:$4 sm:$0xff]  }
  0x76   :  { %v1272_v24 = vld [vmem:[#allocation8 + $0x60] ss:$8 sps:$4 sm:$0xff]   ;;  %v1273_v25 = vld [vmem:[#allocation8 + $0x74] ss:$8 sps:$4 sm:$0xff]   ;;  %v1275_v26 = vld [vmem:[#allocation8 + $0x70] ss:$8 sps:$4 sm:$0xff]  }
  0x77   :  { %1075 = vmatmul.mubr.msk.bf16.vlgmr.msra.gmra.mrb[0].mxu1 %vm184_vm0, %v113_v8  ;;  %677 = vmatpush1.bf16.msra.mxu0 %v1257_v13  ;;  %v1276_v27 = vld [vmem:[#allocation8 + $0x84] ss:$8 sps:$4 sm:$0xff]   ;;  %v1278_v28 = vld [vmem:[#allocation8 + $0x80] ss:$8 sps:$4 sm:$0xff]   ;;  %v1279_v29 = vld [vmem:[#allocation8 + $0x94] ss:$8 sps:$4 sm:$0xff]  }
  0x78   :  { %230 = vmatpush1.bf16.msra.mxu1 %v1246_v7  ;;  %261 = vmatprep.mubr.bf16.mxu1 %v1548_v0  ;;  %v1281_v30 = vld [vmem:[#allocation8 + $0x90] ss:$8 sps:$4 sm:$0xff]   ;;  %v1282_v31 = vld [vmem:[#allocation8 + $0xa4] ss:$8 sps:$4 sm:$0xff]   ;;  %v1284_v32 = vld [vmem:[#allocation8 + $0xa0] ss:$8 sps:$4 sm:$0xff]  }
  0x79   :  { %231 = vmatprep.subr.bf16.mxu1 %v1251_v12  ;;  %678 = vmatprep.subr.bf16.mxu0 %v1258_v14  ;;  %v1285_v33 = vld [vmem:[#allocation8 + $0xb4] ss:$8 sps:$4 sm:$0xff]   ;;  %v1287_v34 = vld [vmem:[#allocation8 + $0xb0] ss:$8 sps:$4 sm:$0xff]   ;;  %v1288_v35 = vld [vmem:[#allocation8 + $0xc4] ss:$8 sps:$4 sm:$0xff]  }
  0x7a   :  { %v1290_v36 = vld [vmem:[#allocation8 + $0xc0] ss:$8 sps:$4 sm:$0xff]   ;;  %v1291_v37 = vld [vmem:[#allocation8 + $0xd4] ss:$8 sps:$4 sm:$0xff]   ;;  %v1293_v38 = vld [vmem:[#allocation8 + $0xd0] ss:$8 sps:$4 sm:$0xff]  }
  0x7b   :  { %679 = vmatpush1.bf16.msra.mxu0 %v1260_v16  ;;  %v1294_v39 = vld [vmem:[#allocation8 + $0xe4] ss:$8 sps:$4 sm:$0xff]   ;;  %v1296_v40 = vld [vmem:[#allocation8 + $0xe0] ss:$8 sps:$4 sm:$0xff]   ;;  %v1297_v41 = vld [vmem:[#allocation8 + $0xf4] ss:$8 sps:$4 sm:$0xff]  }
  0x7c   :  { %232 = vmatpush1.bf16.msra.mxu1 %v1249_v15  ;;  %680 = vmatprep.subr.bf16.mxu0 %v1261_v17  ;;  %v1299_v42 = vld [vmem:[#allocation8 + $0xf0] ss:$8 sps:$4 sm:$0xff]   ;;  %v1302_v43 = vld [vmem:[#allocation8 + $0x104] ss:$8 sps:$4 sm:$0xff]   ;;  %v126_v58 = vsub.s32 0, %v1676_v57  ;;  %v130_v60 = vsub.s32 1, %v1676_v57 }
  0x7d   :  { %v1348_v44 = vld [vmem:[#allocation10 + $0x40] sm:$0xff]   ;;  %v1350_v46 = vld [vmem:[#allocation10 + $0x48] sm:$0xff]   ;;  %v1352_v48 = vld [vmem:[#allocation10 + $0x50] sm:$0xff]   ;;  %v138_v4 = vsub.s32 3, %v1676_v57  ;;  %vm1550_vm1 = vmmov 0   ;;  %s1551_s20 = smov [#allocation13]  }
  0x7e   :  { %v1349_v45 = vld [vmem:[#allocation10] sm:$0xff]   ;;  %1167 = vmatprep.subr.bf16.mxu1 %v1348_v44  ;;  %v1351_v47 = vld [vmem:[#allocation10 + $0x8] sm:$0xff]   ;;  %v1353_v49 = vld [vmem:[#allocation10 + $0x10] sm:$0xff]   ;;  %s1055_s21 = sshll.u32 %s1551_s20, 4  ;;  %s1056_s21 = int_to_ptr.vmem [resolvable:$true] %s1055_s21 }
  0x7f   :  { %1076 = vmatmul.mubr.msk.bf16.vlgmr.msra.gmra.mrb[4].mxu1 %vm184_vm0, %v113_v8  ;;  %681 = vmatpush1.bf16.msra.mxu0 %v1263_v18  ;;  %v1354_v50 = vld [vmem:[#allocation10 + $0x58] sm:$0xff]   ;;  %v1356_v52 = vld [vmem:[#allocation10 + $0x60] sm:$0xff]   ;;  %v1358_v54 = vld [vmem:[#allocation10 + $0x68] sm:$0xff]   ;;  %p1509_p7 = scmp.lt.s32.totalorder %s1056_s21, %s1056_s21 }
  0x80   :  { %682 = vmatprep.subr.bf16.mxu0 %v1264_v19  ;;  %1168 = vmatpush3.bf16.msra.mxu1 %v1349_v45  ;;  %v1355_v51 = vld [vmem:[#allocation10 + $0x18] sm:$0xff]   ;;  %v1357_v53 = vld [vmem:[#allocation10 + $0x20] sm:$0xff]   ;;  %v1359_v55 = vld [vmem:[#allocation10 + $0x28] sm:$0xff]  }
  0x81   :  { %1169 = vmatprep.subr.bf16.mxu1 %v1350_v46  ;;  %v1679_v59 = vld [vmem:[#allocation7] sm:$0xf]  ;;  %v1300_v9 = vld [vmem:[#allocation8 + $0x100] ss:$8 sps:$4 sm:$0xff]   ;;  %v1303_v15 = vld [vmem:[#allocation8 + $0x110] ss:$8 sps:$4 sm:$0xff]  }
  0x82   :  { %v127_v61 = vrot.slane %v1679_v59, %v126_v58  ;;  %v131_v62 = vrot.slane %v1679_v59, %v130_v60  ;;  %v139_v10 = vrot.slane %v1679_v59, %v138_v4  ;;  %v1305_v12 = vld [vmem:[#allocation8 + $0x114] ss:$8 sps:$4 sm:$0xff]   ;;  %v1308_v18 = vld [vmem:[#allocation8 + $0x124] ss:$8 sps:$4 sm:$0xff]   ;;  %v1339_v45 = vld [vmem:[#allocation8 + $0x1d0] ss:$8 sps:$4 sm:$0xff]  }
  0x83   :  { %683 = vmatpush1.bf16.msra.mxu0 %v1266_v20  ;;  %v1341_v44 = vld [vmem:[#allocation8 + $0x1d4] ss:$8 sps:$4 sm:$0xff]  }
  0x84   :  { %684 = vmatprep.subr.bf16.mxu0 %v1267_v21  ;;  %1170 = vmatpush3.bf16.msra.mxu1 %v1351_v47  ;;  %v1306_v21 = vld [vmem:[#allocation8 + $0x120] ss:$8 sps:$4 sm:$0xff]   ;;  %v1344_v47 = vld [vmem:[#allocation8 + $0x1e4] ss:$8 sps:$4 sm:$0xff]   ;;  %v1362_v56 = vld [vmem:[#allocation10 + $0x78] sm:$0xff]  }
  0x85   :  { %1171 = vmatprep.subr.bf16.mxu1 %v1352_v48  ;;  %v1342_v48 = vld [vmem:[#allocation8 + $0x1e0] ss:$8 sps:$4 sm:$0xff]  }
  0x87   :  { %685 = vmatpush1.bf16.msra.mxu0 %v1269_v22 }
  0x88   :  { %686 = vmatprep.subr.bf16.mxu0 %v1270_v23  ;;  %1172 = vmatpush3.bf16.msra.mxu1 %v1353_v49  ;;  %v1311_v23 = vld [vmem:[#allocation8 + $0x134] ss:$8 sps:$4 sm:$0xff]  }
  0x89   :  { %1173 = vmatprep.subr.bf16.mxu1 %v1354_v50  ;;  %v1347_v50 = vld [vmem:[#allocation8 + $0x1f4] ss:$8 sps:$4 sm:$0xff]  }
  0x8b   :  { %687 = vmatpush1.bf16.msra.mxu0 %v1272_v24  ;;  %v1309_v24 = vld [vmem:[#allocation8 + $0x130] ss:$8 sps:$4 sm:$0xff]  }
  0x8c   :  { %688 = vmatprep.subr.bf16.mxu0 %v1273_v25  ;;  %1174 = vmatpush3.bf16.msra.mxu1 %v1355_v51  ;;  %v1314_v25 = vld [vmem:[#allocation8 + $0x144] ss:$8 sps:$4 sm:$0xff]   ;;  %v1345_v51 = vld [vmem:[#allocation8 + $0x1f0] ss:$8 sps:$4 sm:$0xff]  }
  0x8d   :  { %1175 = vmatprep.subr.bf16.mxu1 %v1356_v52 }
  0x8f   :  { %689 = vmatpush1.bf16.msra.mxu0 %v1275_v26  ;;  %v1312_v26 = vld [vmem:[#allocation8 + $0x140] ss:$8 sps:$4 sm:$0xff]  }
  0x90   :  { %690 = vmatprep.subr.bf16.mxu0 %v1276_v27  ;;  %1176 = vmatpush3.bf16.msra.mxu1 %v1357_v53  ;;  %v1317_v27 = vld [vmem:[#allocation8 + $0x154] ss:$8 sps:$4 sm:$0xff]  }
  0x91   :  { %1177 = vmatprep.subr.bf16.mxu1 %v1358_v54  ;;  %v1360_v54 = vld [vmem:[#allocation10 + $0x70] sm:$0xff]  }
  0x93   :  { %691 = vmatpush1.bf16.msra.mxu0 %v1278_v28  ;;  %v1315_v28 = vld [vmem:[#allocation8 + $0x150] ss:$8 sps:$4 sm:$0xff]  }
  0x94   :  { %692 = vmatprep.subr.bf16.mxu0 %v1279_v29  ;;  %1178 = vmatpush3.bf16.msra.mxu1 %v1359_v55  ;;  %v1320_v29 = vld [vmem:[#allocation8 + $0x164] ss:$8 sps:$4 sm:$0xff]   ;;  %v1361_v55 = vld [vmem:[#allocation10 + $0x30] sm:$0xff]  }
  0x95   :  { %1179 = vmatprep.subr.bf16.mxu1 %v1360_v54 }
  0x97   :  { %693 = vmatpush1.bf16.msra.mxu0 %v1281_v30  ;;  %v1318_v30 = vld [vmem:[#allocation8 + $0x160] ss:$8 sps:$4 sm:$0xff]  }
  0x98   :  { %694 = vmatprep.subr.bf16.mxu0 %v1282_v31  ;;  %v1323_v31 = vld [vmem:[#allocation8 + $0x174] ss:$8 sps:$4 sm:$0xff]   ;;  %1180 = vmatpush3.bf16.msra.mxu1 %v1361_v55 }
  0x99   :  { %1181 = vmatprep.subr.bf16.mxu1 %v1362_v56 }
  0x9b   :  { %695 = vmatpush1.bf16.msra.mxu0 %v1284_v32  ;;  %v1321_v32 = vld [vmem:[#allocation8 + $0x170] ss:$8 sps:$4 sm:$0xff]  }
  0x9c   :  { %696 = vmatprep.subr.bf16.mxu0 %v1285_v33  ;;  %v1326_v33 = vld [vmem:[#allocation8 + $0x184] ss:$8 sps:$4 sm:$0xff]  }
  0x9f   :  { %697 = vmatpush1.bf16.msra.mxu0 %v1287_v34  ;;  %v1324_v34 = vld [vmem:[#allocation8 + $0x180] ss:$8 sps:$4 sm:$0xff]  }
  0xa0   :  { %698 = vmatprep.subr.bf16.mxu0 %v1288_v35  ;;  %v1329_v35 = vld [vmem:[#allocation8 + $0x194] ss:$8 sps:$4 sm:$0xff]  }
  0xa3   :  { %699 = vmatpush1.bf16.msra.mxu0 %v1290_v36  ;;  %v1327_v36 = vld [vmem:[#allocation8 + $0x190] ss:$8 sps:$4 sm:$0xff]  }
  0xa4   :  { %700 = vmatprep.subr.bf16.mxu0 %v1291_v37  ;;  %v1332_v37 = vld [vmem:[#allocation8 + $0x1a4] ss:$8 sps:$4 sm:$0xff]  }
  0xa7   :  { %701 = vmatpush1.bf16.msra.mxu0 %v1293_v38  ;;  %v1330_v38 = vld [vmem:[#allocation8 + $0x1a0] ss:$8 sps:$4 sm:$0xff]  }
  0xa8   :  { %702 = vmatprep.subr.bf16.mxu0 %v1294_v39  ;;  %v1335_v39 = vld [vmem:[#allocation8 + $0x1b4] ss:$8 sps:$4 sm:$0xff]  }
  0xab   :  { %703 = vmatpush1.bf16.msra.mxu0 %v1296_v40  ;;  %v1333_v40 = vld [vmem:[#allocation8 + $0x1b0] ss:$8 sps:$4 sm:$0xff]  }
  0xac   :  { %704 = vmatprep.subr.bf16.mxu0 %v1297_v41  ;;  %v1338_v41 = vld [vmem:[#allocation8 + $0x1c4] ss:$8 sps:$4 sm:$0xff]  }
  0xaf   :  { %705 = vmatpush1.bf16.msra.mxu0 %v1299_v42  ;;  %v1336_v42 = vld [vmem:[#allocation8 + $0x1c0] ss:$8 sps:$4 sm:$0xff]  }
  0xb0   :  { %715 = vmatprep.subr.bf16.mxu0 %v1302_v43  ;;  %v134_v43 = vsub.s32 2, %v1676_v57  ;;  %v1367_v57 = vld [vmem:[#allocation11 + $0x18] sm:$0xff]  }
  0xb2   :  { %v135_v46 = vrot.slane %v1679_v59, %v134_v43  ;;  %v1363_v59 = vld [vmem:[#allocation10 + $0x38] sm:$0xff]  }
  0xb3   :  { %1182 = vmatpush3.bf16.msra.mxu1 %v1363_v59 }
 0x14a   :  { %v222_v63 = vpop.f32.mrb[0].mxu1 }
 0x14b   :  { %v223_v0 = vadd.f32 %v222_v63, %v127_v61  ;;  %v224_v1 = vpop.f32.mrb[1].mxu1  ;;  %v1549_v61 = vmov 0.0  }
 0x14c   :  { %v225_v2 = vadd.f32 %v224_v1, %v131_v62  ;;  %v226_v3 = vpop.f32.mrb[2].mxu1  ;;  %1198 = vmatprep.subr.bf16.mxu1 %v1549_v61  ;;  %v342_v62 = vld [vmem:[%s1724_s4] sm:$0x3] }
 0x14d   :  { %v270_v5 = vmax.f32 %v223_v0, 0.0  ;;  %v227_v6 = vpop.f32.mrb[3].mxu1  ;;  %v347_v63 = vrot.slane %v342_v62, %v126_v58  ;;  %v351_v0 = vrot.slane %v342_v62, %v130_v60  ;;  %v1366_v58 = vld [vmem:[#allocation11 + $0x10] sm:$0xff]   ;;  %v1368_v60 = vld [vmem:[#allocation11 + $0x20] sm:$0xff]  }
 0x14e   :  { %v271_v7 = vmax.f32 %v225_v2, 0.0 }
 0x14f   :  { %v274_v11 = vpack.c.bf16 %v270_v5, %v270_v5 }
 0x150   :  { %v275_v8 = vpack.c.bf16 %v271_v7, %v271_v7 }
 0x152   :  { %706 = vmatprep.mubr.bf16.mxu0 %v275_v8  ;;  %v1690_v13 = vpop.f32.mrb[4].mxu1 }
 0x153   :  { %707 = vmatmul.mubr.bf16.vlgmr.msra.gmra.mrb[0].mxu0 %v274_v11  ;;  %v265_v14 = vpop.f32.mrb[5].mxu1  ;;  %v264_v49 = vadd.f32 %v1690_v13, %v135_v46  ;;  %v1369_v13 = vld [vmem:[#allocation11 + $0x28] sm:$0xff]  }
 0x154   :  { %716 = vmatpush1.bf16.msra.mxu0 %v1300_v9  ;;  %v266_v16 = vadd.f32 %v265_v14, %v139_v10  ;;  %v267_v17 = vpop.f32.mrb[6].mxu1  ;;  %v1364_v10 = vld [vmem:[#allocation11] sm:$0xff]   ;;  %v1370_v14 = vld [vmem:[#allocation11 + $0x30] sm:$0xff]  }
 0x155   :  { %717 = vmatprep.subr.bf16.mxu0 %v1305_v12  ;;  %v268_v19 = vpop.f32.mrb[7].mxu1  ;;  %v272_v52 = vmax.f32 %v264_v49, 0.0  ;;  %v1365_v12 = vld [vmem:[#allocation11 + $0x8] sm:$0xff]   ;;  %v1141_v17 = vld [vmem:[%s1726_s6] ss:$0 sm:$0xff]  ;;  %s1504_s6 = scalar_lea.vmem %s1056_s21, 128 }
 0x156   :  { %v273_v20 = vmax.f32 %v266_v16, 0.0  ;;  %p1505_p6 = scmp.ne.s32.totalorder %s1056_s21, %s1504_s6  ;;  %p1510_p8 = scmp.lt.s32.totalorder %s1504_s6, %s1504_s6 }
 0x157   :  { %v276_v53 = vpack.c.bf16 %v272_v52, %v272_v52 }
 0x158   :  { %718 = vmatpush1.bf16.msra.mxu0 %v1303_v15  ;;  %v277_v22 = vpack.c.bf16 %v273_v20, %v273_v20  ;;  %v1371_v15 = vld [vmem:[#allocation11 + $0x38] sm:$0xff]   ;;  %p1511_p9 = por %p1510_p8, %p1509_p7 }
 0x159   :  { %719 = vmatprep.subr.bf16.mxu0 %v1308_v18 }
 0x15a   :  { %747 = vmatprep.mubr.bf16.mxu0 %v277_v22  ;;  %p1512_p10 = pnand %p1511_p9, %p1505_p6 }
 0x15c   :  { %720 = vmatpush1.bf16.msra.mxu0 %v1306_v21 }
 0x15d   :  { %721 = vmatprep.subr.bf16.mxu0 %v1311_v23 }
 0x160   :  { %722 = vmatpush1.bf16.msra.mxu0 %v1309_v24 }
 0x161   :  { %723 = vmatprep.subr.bf16.mxu0 %v1314_v25  ;;  %v1158_v25 = vld [vmem:[%s1728_s8] ss:$0 sm:$0xff] }
 0x164   :  { %724 = vmatpush1.bf16.msra.mxu0 %v1312_v26 }
 0x165   :  { %725 = vmatprep.subr.bf16.mxu0 %v1317_v27 }
 0x168   :  { %726 = vmatpush1.bf16.msra.mxu0 %v1315_v28 }
 0x169   :  { %727 = vmatprep.subr.bf16.mxu0 %v1320_v29 }
 0x16c   :  { %728 = vmatpush1.bf16.msra.mxu0 %v1318_v30 }
 0x16d   :  { %729 = vmatprep.subr.bf16.mxu0 %v1323_v31 }
 0x170   :  { %730 = vmatpush1.bf16.msra.mxu0 %v1321_v32 }
 0x171   :  { %731 = vmatprep.subr.bf16.mxu0 %v1326_v33 }
 0x174   :  { %732 = vmatpush1.bf16.msra.mxu0 %v1324_v34 }
 0x175   :  { %733 = vmatprep.subr.bf16.mxu0 %v1329_v35 }
 0x178   :  { %734 = vmatpush1.bf16.msra.mxu0 %v1327_v36 }
 0x179   :  { %735 = vmatprep.subr.bf16.mxu0 %v1332_v37 }
 0x17c   :  { %736 = vmatpush1.bf16.msra.mxu0 %v1330_v38 }
 0x17d   :  { %737 = vmatprep.subr.bf16.mxu0 %v1335_v39 }
 0x180   :  { %738 = vmatpush1.bf16.msra.mxu0 %v1333_v40 }
 0x181   :  { %739 = vmatprep.subr.bf16.mxu0 %v1338_v41 }
 0x184   :  { %740 = vmatpush1.bf16.msra.mxu0 %v1336_v42 }
 0x185   :  { %741 = vmatprep.subr.bf16.mxu0 %v1341_v44 }
 0x188   :  { %742 = vmatpush1.bf16.msra.mxu0 %v1339_v45 }
 0x189   :  { %743 = vmatprep.subr.bf16.mxu0 %v1344_v47 }
 0x18c   :  { %744 = vmatpush1.bf16.msra.mxu0 %v1342_v48 }
 0x18d   :  { %745 = vmatprep.subr.bf16.mxu0 %v1347_v50 }
 0x190   :  { %746 = vmatpush1.bf16.msra.mxu0 %v1345_v51 }
 0x193   :  { %748 = vmatmul.mubr.bf16.vlgmr.msra.gmra.mrb[0].mxu0 %v276_v53 }
 0x266   :  { %v749_v1 = vpop.f32.mrb[0].mxu0 }
 0x267   :  { %v1218_v2 = vadd.f32 %v749_v1, %v347_v63  ;;  %v751_v3 = vpop.f32.mrb[1].mxu0 }
 0x268   :  { %v1219_v4 = vadd.f32 %v751_v3, %v351_v0  ;;  %v753_v5 = vpop.f32.mrb[2].mxu0 }
 0x269   :  { %v756_v6 = vmax.f32 %v1218_v2, 0.0  ;;  %v754_v7 = vpop.f32.mrb[3].mxu0 }
 0x26a   :  { %v757_v8 = vmax.f32 %v1219_v4, 0.0 }
 0x26b   :  { %v758_v11 = vpack.c.bf16 %v756_v6, %v756_v6 }
 0x26c   :  { %v759_v9 = vpack.c.bf16 %v757_v8, %v757_v8 }
 0x26e   :  { %927 = vmatprep.mubr.bf16.mxu1 %v759_v9 }
 0x26f   :  { %928 = vmatmul.mubr.bf16.vlgmr.msra.gmra.mrb[8].mxu1 %v758_v11 }
 0x270   :  { %1199 = vmatpush3.bf16.msra.mxu1 %v1364_v10  ;;  %1214 = vmatprep.mubr.msk.bf16.mxu1 %vm1550_vm1, %v1549_v61 }
 0x271   :  { %1200 = vmatprep.subr.bf16.mxu1 %v1549_v61 }
 0x274   :  { %1201 = vmatpush3.bf16.msra.mxu1 %v1365_v12 }
 0x275   :  { %1202 = vmatprep.subr.bf16.mxu1 %v1549_v61 }
 0x278   :  { %1203 = vmatpush3.bf16.msra.mxu1 %v1366_v58 }
 0x279   :  { %1204 = vmatprep.subr.bf16.mxu1 %v1549_v61 }
 0x27c   :  { %1205 = vmatpush3.bf16.msra.mxu1 %v1367_v57 }
 0x27d   :  { %1206 = vmatprep.subr.bf16.mxu1 %v1549_v61 }
 0x280   :  { %1207 = vmatpush3.bf16.msra.mxu1 %v1368_v60 }
 0x281   :  { %1208 = vmatprep.subr.bf16.mxu1 %v1549_v61 }
 0x284   :  { %1209 = vmatpush3.bf16.msra.mxu1 %v1369_v13 }
 0x285   :  { %1210 = vmatprep.subr.bf16.mxu1 %v1549_v61 }
 0x288   :  { %1211 = vmatpush3.bf16.msra.mxu1 %v1370_v14 }
 0x289   :  { %1212 = vmatprep.subr.bf16.mxu1 %v1549_v61 }
 0x28c   :  { %1213 = vmatpush3.bf16.msra.mxu1 %v1371_v15 }
 0x342   :  { %v1183_v16 = vpop.f32.mrb[8].mxu1 }
 0x343   :  { %v1184_v18 = vpop.f32.mrb[9].mxu1 }
 0x344   :  { %v1185_v19 = vadd.f32 %v1184_v18, %v1183_v16  ;;  %v1186_v20 = vpop.f32.mrb[10].mxu1 }
 0x345   :  { %v1187_v21 = vpop.f32.mrb[11].mxu1 }
 0x346   :  { %v930_v22 = vadd.f32 %v1185_v19, %v1141_v17 }
 0x348   :  { %v935_v23 = vmax.f32 %v930_v22, 0.0 }
 0x34a   :  { %v936_v24 = vpack.c.bf16 %v935_v23, %v935_v23 }
 0x34c   :  { %1215 = vmatmul.mubr.bf16.vlgmr.msra.gmra.mrb[12].mxu1 %v936_v24 }
 0x41f   :  { %v1042_v26 = vpop.f32.mrb[12].mxu1 }
 0x420   :  { %v1043_v27 = vadd.f32 %v1158_v25, %v1042_v26  ;;  %v1216_v28 = vpop.f32.mrb[13].mxu1 }
 0x421   :  { %v1045_v29 = vpop.f32.mrb[14].mxu1 }
 0x422   :  { %1048 = vst [vmem:[#allocation13] sm:$0xff] %v1043_v27  ;;  %v1217_v30 = vpop.f32.mrb[15].mxu1 }
 0x423   :  { %1515 = shalt.err (!%p1512_p10)
}
 0x424   :  { %s1516_s8 = scalar_lea.hbm %s1729_s9, 128 }
 0x425   :  { %p1517_p11 = scmp.ne.s32.totalorder %s1729_s9, %s1516_s8  ;;  %p1520_p12 = scmp.lt.u32.totalorder %s1516_s8, %s1729_s9 }
 0x427   :  { %p1522_p13 = pnand %p1520_p12, %p1517_p11 }
 0x429   :  { %1525 = shalt.err (!%p1522_p13)
}
 0x42a   :  { %1058 = dma.vmem_to_hbm [thread:$0]  %s1056_s21, 128, %s1729_s9, [#allocation4]  }
 0x42b   :  { %1534 = dma.done.wait [#allocation4], 128  }
 0x42c   :  { %1535 = vsyncadd [#allocation4], 4294967168 }
 0x42d   :  { %1062 = vsyncpa [#allocation3], 1 }
 0x42e   :  { %1063 = vsyncpa [#allocation6], 1 }
 0x42f   :  { %1064 = vsyncpa [#allocation9], 1 }
 0x430   :  { %1065 = vsyncpa [#allocation12], 1 }
 0x431   :  { %1066 = vsyncpa [#allocation4], 1 }

</bundles_post_ra>
